<compile_context>
chip_gen: v5e
topology: v5e:2x2
jax: 0.10.0
libtpu: 0.0.40
codegen_flags: <defaults>
</compile_context>

<pallas_src>
import functools

import numpy as np
import jax
import jax.numpy as jnp
from jax.experimental import pallas as pl
from jax.experimental.pallas import tpu as pltpu

SMOOTH_NR = 1e-5  # MONAI DiceLoss defaults
SMOOTH_DR = 1e-5


def _pad8(r):
    return ((r + 7) // 8) * 8


def _dice_ce_kernel(w_ref, x_ref, lbl_ref, out_ref, acc_ref,
                    *, num_classes, include_background, mask_tail):
    C = num_classes
    s = pl.program_id(1)
    s_last = pl.num_programs(1) - 1

    x = x_ref[0].astype(jnp.float32)        # (C, TS) logits for this (batch, spatial tile)
    lbl = lbl_ref[0].astype(jnp.int32)      # (1, TS) labels (padded tail carries label == C)
    w = w_ref[...].astype(jnp.float32)      # (C, 1) class weights

    TS = x.shape[1]
    cls_iota = jax.lax.broadcasted_iota(jnp.int32, (C, TS), 0)
    onehot = (cls_iota == lbl).astype(jnp.float32)             # (C, TS); all-zero on padded tail

    # ---- weighted cross-entropy lane partials (softmax over channel/sublane axis) ----
    m = jnp.max(x, axis=0, keepdims=True)                      # (1, TS)
    lse = m + jnp.log(jnp.sum(jnp.exp(x - m), axis=0, keepdims=True))
    x_y = jnp.sum(onehot * x, axis=0, keepdims=True)           # logit of the true class
    w_y = jnp.sum(onehot * w, axis=0, keepdims=True)           # weight of the true class (0 on pad)

    # ---- dice lane partials; sigmoid via tanh (single EUP transcendental) ----
    sig = 0.5 * jnp.tanh(0.5 * x) + 0.5
    if mask_tail:
        valid = (lbl < C).astype(jnp.float32)                  # 0 on padded tail positions
        sig = sig * valid

    # ---- single fused accumulator addend: one ld/add/st stream per step ----
    addend = jnp.concatenate(
        [onehot * sig,                 # rows [0, C):   intersection partials
         onehot + sig,                 # rows [C, 2C):  ground_o + pred_o partials
         w_y * (lse - x_y),            # row 2C:        CE numerator partials
         w_y],                         # row 2C+1:      CE denominator partials
        axis=0)                                                 # (2C+2, TS)

    @pl.when(s == 0)
    def _():
        acc_ref[...] = addend

    @pl.when(s != 0)
    def _():
        acc_ref[...] += addend

    # ---- finalize partials for this batch element (per-batch outputs) ----
    @pl.when(s == s_last)
    def _():
        tot = jnp.sum(acc_ref[...], axis=1, keepdims=True)      # (2C+2, 1)
        inter = tot[0:C, :]                                      # (C, 1)
        den = tot[C:2 * C, :]                                    # (C, 1) = ground_o + pred_o
        ce_num_b = tot[2 * C, 0]
        ce_den_b = tot[2 * C + 1, 0]

        f = 1.0 - (2.0 * inter + SMOOTH_NR) / (den + SMOOTH_DR)
        if not include_background:
            ch_iota = jax.lax.broadcasted_iota(jnp.int32, f.shape, 0)
            f = jnp.where(ch_iota > 0, f, 0.0)
        dice_b = jnp.sum(f)

        row = jax.lax.broadcasted_iota(jnp.int32, out_ref.shape[1:], 0)   # (8, 128)
        payload = jnp.where(row == 0, dice_b,
                  jnp.where(row == 1, ce_num_b,
                  jnp.where(row == 2, ce_den_b, 0.0)))
        out_ref[0] = payload


def _choose_spatial_tiling(S, C, logit_itemsize, vmem_budget=24 << 20, hard_cap=65536):
    """Pick (spatial_tile, padded_S, needs_mask). Tile is always a multiple of 128."""
    # per-spatial-element VMEM cost: double-buffered logits + double-buffered labels + accumulator
    bytes_per_elem = (2 * _pad8(C) * logit_itemsize
                      + 2 * 8 * 4
                      + _pad8(2 * C + 2) * 4)
    cap = max(128, min(hard_cap, (vmem_budget // bytes_per_elem) // 128 * 128))

    s_pad = -(-S // 128) * 128
    if s_pad <= cap:                                   # whole image in one tile
        return s_pad, s_pad, s_pad != S

    if S % 128 == 0:                                   # exact tiling: largest 128-multiple divisor
        m, best = S // 128, 0
        for d in range(1, m + 1):
            if m % d == 0 and d * 128 <= cap:
                best = d * 128
        if best >= cap // 4:                           # big enough that per-step overhead amortizes
            return best, S, False

    # padded tiling: n equal tiles, tail positions masked in-kernel
    n = -(-S // cap)
    tile = -(-S // (n * 128)) * 128
    return tile, n * tile, True


def dice_ce_loss(y_pred, y_true, weight, include_background=True, spatial_tile=None):
    """y_pred: (N, C, H, W) float logits; y_true: (N, 1, H, W) integer labels."""
    N, C, H, W = y_pred.shape
    S = H * W

    logit_itemsize = jnp.dtype(y_pred.dtype).itemsize
    if spatial_tile is None:
        tile, S_pad, mask_tail = _choose_spatial_tiling(S, C, logit_itemsize)
    else:
        assert spatial_tile % 128 == 0, "spatial_tile must be a multiple of 128"
        tile = spatial_tile
        S_pad = -(-S // tile) * tile
        mask_tail = S_pad != S

    # No wrapper-side upcasts: logits stay in their input dtype (cast in-kernel).
    x = y_pred.reshape(N, C, S)
    lbl = y_true.reshape(N, 1, S)
    if not jnp.issubdtype(lbl.dtype, jnp.integer):
        lbl = lbl.astype(jnp.int32)
    if mask_tail:
        lbl = lbl.astype(jnp.int32)
        pad = S_pad - S
        x = jnp.pad(x, ((0, 0), (0, 0), (0, pad)))
        lbl = jnp.pad(lbl, ((0, 0), (0, 0), (0, pad)), constant_values=C)  # sentinel -> masked

    w = jnp.asarray(np.array(weight), jnp.float32)
    if not include_background:
        w = w.at[0].set(0.0)                 # CELoss.__init__ semantics
    w2 = w.reshape(C, 1)

    kernel = functools.partial(_dice_ce_kernel, num_classes=C,
                               include_background=include_background,
                               mask_tail=mask_tail)

    # VMEM limit derived from the actual buffers; capped at 48 MiB (v7x has 64 MiB physical).
    est = ((2 * _pad8(C) * logit_itemsize + 2 * 8 * 4 + _pad8(2 * C + 2) * 4) * tile
           + 2 * 8 * 128 * 4 + _pad8(C) * 128 * 4)
    vmem_limit = int(min(max(1.5 * est + (2 << 20), 16 << 20), 48 << 20))

    # Per-batch partials: row 0 = sum_c dice term, row 1 = CE numerator, row 2 = CE denominator.
    parts = pl.pallas_call(
        kernel,
        out_shape=jax.ShapeDtypeStruct((N, 8, 128), jnp.float32),
        grid_spec=pltpu.PrefetchScalarGridSpec(
            num_scalar_prefetch=0,
            grid=(N, S_pad // tile),
            in_specs=[
                pl.BlockSpec((C, 1), lambda n, s: (0, 0)),                # class weights
                pl.BlockSpec((1, C, tile), lambda n, s: (n, 0, s)),       # logits
                pl.BlockSpec((1, 1, tile), lambda n, s: (n, 0, s)),       # labels
            ],
            out_specs=pl.BlockSpec((1, 8, 128), lambda n, s: (n, 0, 0)),
            scratch_shapes=[pltpu.VMEM((2 * C + 2, tile), jnp.float32)],  # fused accumulator
        ),
        compiler_params=pltpu.CompilerParams(
            dimension_semantics=("parallel", "arbitrary"),   # batch outer, spatial reduction last
            vmem_limit_bytes=vmem_limit,
        ),
    )(w2, x, lbl)

    dice_sum = jnp.sum(parts[:, 0, 0])
    ce_num = jnp.sum(parts[:, 1, 0])
    ce_den = jnp.sum(parts[:, 2, 0])        # can be 0 only if every weighted pixel has weight 0
    c_eff = C if include_background else C - 1
    dice = dice_sum / float(N * c_eff)
    ce = ce_num / ce_den
    return dice + ce


def dice_ce_loss_ref(y_pred, y_true, weight, include_background=True):
    """Pure-JAX reference mirroring monai.losses.DiceLoss + torch CrossEntropyLoss."""
    N, C, H, W = y_pred.shape
    x = y_pred.astype(jnp.float32)
    lbl = y_true.reshape(N, H, W).astype(jnp.int32)
    onehot = jax.nn.one_hot(lbl, C, axis=1, dtype=jnp.float32)   # (N, C, H, W)

    # dice on sigmoid(logits)
    inp, tgt = jax.nn.sigmoid(x), onehot
    if not include_background:
        inp, tgt = inp[:, 1:], tgt[:, 1:]
    inter = jnp.sum(tgt * inp, axis=(2, 3))
    go = jnp.sum(tgt, axis=(2, 3))
    po = jnp.sum(inp, axis=(2, 3))
    dice = jnp.mean(1.0 - (2.0 * inter + SMOOTH_NR) / (go + po + SMOOTH_DR))

    # weighted cross entropy
    w = jnp.asarray(np.array(weight), jnp.float32)
    if not include_background:
        w = w.at[0].set(0.0)
    logp = jax.nn.log_softmax(x, axis=1)
    lp_y = jnp.take_along_axis(logp, lbl[:, None], axis=1)[:, 0]  # (N, H, W)
    w_y = w[lbl]
    ce = jnp.sum(-w_y * lp_y) / jnp.sum(w_y)
    return dice + ce


if __name__ == "__main__":
    key = jax.random.PRNGKey(0)
    k1, k2, k3, k4 = jax.random.split(key, 4)
    weight = [0.5, 1.0, 1.5, 2.0]  # deterministic class weights (CELoss weight arg)

    # Case 1: nice spatial size (no padding path).
    N, C, H, W = 2, 4, 16, 16
    y_pred = jax.random.normal(k1, (N, C, H, W), dtype=jnp.float32)
    y_true = jax.random.randint(k2, (N, 1, H, W), 0, C, dtype=jnp.int32)
    for incl_bg in (True, False):
        out = jax.block_until_ready(
            dice_ce_loss(y_pred, y_true, list(weight), include_background=incl_bg))
        ref = jax.block_until_ready(
            dice_ce_loss_ref(y_pred, y_true, list(weight), include_background=incl_bg))
        np.testing.assert_allclose(np.asarray(out), np.asarray(ref), rtol=1e-5, atol=1e-5)

    # Case 2: spatial size not a multiple of 128 (pad + in-kernel tail mask path).
    H2, W2 = 12, 12
    y_pred2 = jax.random.normal(k3, (N, C, H2, W2), dtype=jnp.float32)
    y_true2 = jax.random.randint(k4, (N, 1, H2, W2), 0, C, dtype=jnp.int32)
    out2 = jax.block_until_ready(dice_ce_loss(y_pred2, y_true2, list(weight)))
    ref2 = jax.block_until_ready(dice_ce_loss_ref(y_pred2, y_true2, list(weight)))
    np.testing.assert_allclose(np.asarray(out2), np.asarray(ref2), rtol=1e-5, atol=1e-5)

    print("KERNEL_OK")
</pallas_src>

<mosaic_0001>
module attributes {stable_mosaic.version = 11 : i64} {
  func.func @_dice_ce_kernel(%arg0: i32, %arg1: i32, %arg2: memref<4x1xf32, #tpu.memory_space<vmem>>, %arg3: memref<1x4x256xf32, #tpu.memory_space<vmem>>, %arg4: memref<1x1x256xi32, #tpu.memory_space<vmem>>, %arg5: memref<1x8x128xf32, #tpu.memory_space<vmem>>, %arg6: memref<10x256xf32, #tpu.memory_space<vmem>>) attributes {dimension_semantics = [#tpu.dimension_semantics<parallel>, #tpu.dimension_semantics<arbitrary>], iteration_bounds = array<i64: 2, 1>, scalar_prefetch = 0 : i64, scratch_operands = 1 : i64, tpu.core_type = #tpu.core_type<tc>, window_params = [{pipeline_mode = #tpu.pipeline_mode<synchronous>, transform_indices = @transform_0, window_bounds = array<i64: 4, 1>}, {transform_indices = @transform_1, window_bounds = array<i64: 1, 4, 256>}, {transform_indices = @transform_2, window_bounds = array<i64: 1, 1, 256>}, {transform_indices = @transform_3, window_bounds = array<i64: 1, 8, 128>}]} {
    %c0 = arith.constant 0 : index
    %c0_0 = arith.constant 0 : index
    %c0_1 = arith.constant 0 : index
    %0 = vector.load %arg3[%c0, %c0_0, %c0_1] : memref<1x4x256xf32, #tpu.memory_space<vmem>>, vector<1x4x256xf32>
    %1 = vector.shape_cast %0 : vector<1x4x256xf32> to vector<4x256xf32>
    %c0_2 = arith.constant 0 : index
    %c0_3 = arith.constant 0 : index
    %c0_4 = arith.constant 0 : index
    %2 = vector.load %arg4[%c0_2, %c0_3, %c0_4] : memref<1x1x256xi32, #tpu.memory_space<vmem>>, vector<1x1x256xi32>
    %3 = vector.shape_cast %2 : vector<1x1x256xi32> to vector<1x256xi32>
    %c0_5 = arith.constant 0 : index
    %c0_6 = arith.constant 0 : index
    %4 = vector.load %arg2[%c0_5, %c0_6] : memref<4x1xf32, #tpu.memory_space<vmem>>, vector<4x1xf32>
    %5 = tpu.iota {dimensions = array<i32: 0>} : vector<4x256xi32>
    %6 = vector.broadcast %3 : vector<1x256xi32> to vector<4x256xi32>
    %7 = arith.cmpi eq, %5, %6 : vector<4x256xi32>
    %8 = arith.extui %7 : vector<4x256xi1> to vector<4x256xi32>
    %9 = arith.sitofp %8 : vector<4x256xi32> to vector<4x256xf32>
    %cst = arith.constant dense<0xFF800000> : vector<256xf32>
    %10 = vector.multi_reduction <maximumf>, %1, %cst [0] : vector<4x256xf32> to vector<256xf32>
    %11 = vector.shape_cast %10 : vector<256xf32> to vector<1x256xf32>
    %12 = vector.broadcast %11 : vector<1x256xf32> to vector<4x256xf32>
    %13 = arith.subf %1, %12 : vector<4x256xf32>
    %14 = math.exp %13 : vector<4x256xf32>
    %cst_7 = arith.constant dense<0.000000e+00> : vector<256xf32>
    %15 = vector.multi_reduction <add>, %14, %cst_7 [0] : vector<4x256xf32> to vector<256xf32>
    %16 = vector.shape_cast %15 : vector<256xf32> to vector<1x256xf32>
    %17 = math.log %16 : vector<1x256xf32>
    %18 = arith.addf %11, %17 : vector<1x256xf32>
    %19 = arith.mulf %9, %1 : vector<4x256xf32>
    %cst_8 = arith.constant dense<0.000000e+00> : vector<256xf32>
    %20 = vector.multi_reduction <add>, %19, %cst_8 [0] : vector<4x256xf32> to vector<256xf32>
    %21 = vector.shape_cast %20 : vector<256xf32> to vector<1x256xf32>
    %22 = vector.broadcast %4 : vector<4x1xf32> to vector<4x256xf32>
    %23 = arith.mulf %9, %22 : vector<4x256xf32>
    %cst_9 = arith.constant dense<0.000000e+00> : vector<256xf32>
    %24 = vector.multi_reduction <add>, %23, %cst_9 [0] : vector<4x256xf32> to vector<256xf32>
    %25 = vector.shape_cast %24 : vector<256xf32> to vector<1x256xf32>
    %cst_10 = arith.constant 5.000000e-01 : f32
    %26 = vector.broadcast %cst_10 : f32 to vector<4x256xf32>
    %27 = arith.mulf %26, %1 : vector<4x256xf32>
    %28 = math.tanh %27 : vector<4x256xf32>
    %cst_11 = arith.constant 5.000000e-01 : f32
    %29 = vector.broadcast %cst_11 : f32 to vector<4x256xf32>
    %30 = arith.mulf %29, %28 : vector<4x256xf32>
    %cst_12 = arith.constant 5.000000e-01 : f32
    %31 = vector.broadcast %cst_12 : f32 to vector<4x256xf32>
    %32 = arith.addf %30, %31 : vector<4x256xf32>
    %33 = arith.mulf %9, %32 : vector<4x256xf32>
    %34 = arith.addf %9, %32 : vector<4x256xf32>
    %35 = arith.subf %18, %21 : vector<1x256xf32>
    %36 = arith.mulf %25, %35 : vector<1x256xf32>
    %37 = tpu.concatenate %33, %34, %36, %25 in 0 : vector<4x256xf32>, vector<4x256xf32>, vector<1x256xf32>, vector<1x256xf32> -> vector<10x256xf32>
    %c0_i32 = arith.constant 0 : i32
    %38 = arith.cmpi eq, %arg1, %c0_i32 : i32
    %39 = arith.extui %38 : i1 to i32
    %c0_i32_13 = arith.constant 0 : i32
    %40 = arith.cmpi ne, %39, %c0_i32_13 : i32
    scf.if %40 {
      %c0_18 = arith.constant 0 : index
      %c0_19 = arith.constant 0 : index
      %47 = vector.load %arg6[%c0_18, %c0_19] : memref<10x256xf32, #tpu.memory_space<vmem>>, vector<10x256xf32>
      tpu.vector_store %arg6[%c0_18, %c0_19], %37 {strides = array<i32>} : memref<10x256xf32, #tpu.memory_space<vmem>>, vector<10x256xf32>,
    } else {
    }
    %c0_i32_14 = arith.constant 0 : i32
    %41 = arith.cmpi ne, %arg1, %c0_i32_14 : i32
    %42 = arith.extui %41 : i1 to i32
    %c0_i32_15 = arith.constant 0 : i32
    %43 = arith.cmpi ne, %42, %c0_i32_15 : i32
    scf.if %43 {
      %c0_18 = arith.constant 0 : index
      %c0_19 = arith.constant 0 : index
      %47 = vector.load %arg6[%c0_18, %c0_19] : memref<10x256xf32, #tpu.memory_space<vmem>>, vector<10x256xf32>
      %48 = arith.addf %47, %37 : vector<10x256xf32>
      %c0_20 = arith.constant 0 : index
      %c0_21 = arith.constant 0 : index
      %49 = vector.load %arg6[%c0_20, %c0_21] : memref<10x256xf32, #tpu.memory_space<vmem>>, vector<10x256xf32>
      tpu.vector_store %arg6[%c0_20, %c0_21], %48 {strides = array<i32>} : memref<10x256xf32, #tpu.memory_space<vmem>>, vector<10x256xf32>,
    } else {
    }
    %c0_i32_16 = arith.constant 0 : i32
    %44 = arith.cmpi eq, %arg1, %c0_i32_16 : i32
    %45 = arith.extui %44 : i1 to i32
    %c0_i32_17 = arith.constant 0 : i32
    %46 = arith.cmpi ne, %45, %c0_i32_17 : i32
    scf.if %46 {
      %c0_18 = arith.constant 0 : index
      %c0_19 = arith.constant 0 : index
      %47 = vector.load %arg6[%c0_18, %c0_19] : memref<10x256xf32, #tpu.memory_space<vmem>>, vector<10x256xf32>
      %cst_20 = arith.constant dense<0.000000e+00> : vector<10xf32>
      %48 = vector.multi_reduction <add>, %47, %cst_20 [1] : vector<10x256xf32> to vector<10xf32>
      %49 = vector.shape_cast %48 : vector<10xf32> to vector<10x1xf32>
      %50 = vector.extract_strided_slice %49 {offsets = [0, 0], sizes = [4, 1], strides = [1, 1]} : vector<10x1xf32> to vector<4x1xf32>
      %51 = vector.extract_strided_slice %49 {offsets = [4, 0], sizes = [4, 1], strides = [1, 1]} : vector<10x1xf32> to vector<4x1xf32>
      %52 = vector.extract_strided_slice %49 {offsets = [8, 0], sizes = [1, 1], strides = [1, 1]} : vector<10x1xf32> to vector<1x1xf32>
      %53 = vector.extract %52[0, 0] : f32 from vector<1x1xf32>
      %54 = vector.extract_strided_slice %49 {offsets = [9, 0], sizes = [1, 1], strides = [1, 1]} : vector<10x1xf32> to vector<1x1xf32>
      %55 = vector.extract %54[0, 0] : f32 from vector<1x1xf32>
      %cst_21 = arith.constant 2.000000e+00 : f32
      %56 = vector.broadcast %cst_21 : f32 to vector<4x1xf32>
      %57 = arith.mulf %56, %50 : vector<4x1xf32>
      %cst_22 = arith.constant 9.99999974E-6 : f32
      %58 = vector.broadcast %cst_22 : f32 to vector<4x1xf32>
      %59 = arith.addf %57, %58 : vector<4x1xf32>
      %cst_23 = arith.constant 9.99999974E-6 : f32
      %60 = vector.broadcast %cst_23 : f32 to vector<4x1xf32>
      %61 = arith.addf %51, %60 : vector<4x1xf32>
      %62 = arith.divf %59, %61 : vector<4x1xf32>
      %cst_24 = arith.constant 1.000000e+00 : f32
      %63 = vector.broadcast %cst_24 : f32 to vector<4x1xf32>
      %64 = arith.subf %63, %62 : vector<4x1xf32>
      %65 = vector.shape_cast %64 : vector<4x1xf32> to vector<1x4x1xf32>
      %cst_25 = arith.constant dense<0.000000e+00> : vector<1xf32>
      %66 = vector.multi_reduction <add>, %65, %cst_25 [1, 2] : vector<1x4x1xf32> to vector<1xf32>
      %67 = vector.shape_cast %66 : vector<1xf32> to vector<1x1x1xf32>
      %68 = vector.extract %67[0, 0, 0] : f32 from vector<1x1x1xf32>
      %69 = tpu.iota {dimensions = array<i32: 0>} : vector<8x128xi32>
      %c0_i32_26 = arith.constant 0 : i32
      %70 = vector.broadcast %c0_i32_26 : i32 to vector<8x128xi32>
      %71 = arith.cmpi eq, %69, %70 : vector<8x128xi32>
      %c1_i32 = arith.constant 1 : i32
      %72 = vector.broadcast %c1_i32 : i32 to vector<8x128xi32>
      %73 = arith.cmpi eq, %69, %72 : vector<8x128xi32>
      %c2_i32 = arith.constant 2 : i32
      %74 = vector.broadcast %c2_i32 : i32 to vector<8x128xi32>
      %75 = arith.cmpi eq, %69, %74 : vector<8x128xi32>
      %cst_27 = arith.constant 0.000000e+00 : f32
      %76 = vector.broadcast %55 : f32 to vector<8x128xf32>
      %77 = vector.broadcast %cst_27 : f32 to vector<8x128xf32>
      %78 = arith.select %75, %76, %77 : vector<8x128xi1>, vector<8x128xf32>
      %79 = vector.broadcast %53 : f32 to vector<8x128xf32>
      %80 = arith.select %73, %79, %78 : vector<8x128xi1>, vector<8x128xf32>
      %81 = vector.broadcast %68 : f32 to vector<8x128xf32>
      %82 = arith.select %71, %81, %80 : vector<8x128xi1>, vector<8x128xf32>
      %c0_28 = arith.constant 0 : index
      %c0_29 = arith.constant 0 : index
      %c0_30 = arith.constant 0 : index
      %83 = vector.load %arg5[%c0_28, %c0_29, %c0_30] : memref<1x8x128xf32, #tpu.memory_space<vmem>>, vector<1x8x128xf32>
      %84 = vector.shape_cast %83 : vector<1x8x128xf32> to vector<8x128xf32>
      %85 = vector.shape_cast %82 : vector<8x128xf32> to vector<1x8x128xf32>
      tpu.vector_store %arg5[%c0_28, %c0_29, %c0_30], %85 {strides = array<i32>} : memref<1x8x128xf32, #tpu.memory_space<vmem>>, vector<1x8x128xf32>,
    } else {
    }
    return
  }
  func.func @transform_0(%arg0: i32, %arg1: i32) -> (i32, i32) {
    %c0_i32 = arith.constant 0 : i32
    %c0_i32_0 = arith.constant 0 : i32
    %c0_i32_1 = arith.constant 0 : i32
    return %c0_i32, %c0_i32_0 : i32, i32
  }
  func.func @transform_1(%arg0: i32, %arg1: i32) -> (i32, i32, i32) {
    %c0_i32 = arith.constant 0 : i32
    %c0_i32_0 = arith.constant 0 : i32
    return %arg0, %c0_i32, %arg1 : i32, i32, i32
  }
  func.func @transform_2(%arg0: i32, %arg1: i32) -> (i32, i32, i32) {
    %c0_i32 = arith.constant 0 : i32
    %c0_i32_0 = arith.constant 0 : i32
    return %arg0, %c0_i32, %arg1 : i32, i32, i32
  }
  func.func @transform_3(%arg0: i32, %arg1: i32) -> (i32, i32, i32) {
    %c0_i32 = arith.constant 0 : i32
    %c0_i32_0 = arith.constant 0 : i32
    %c0_i32_1 = arith.constant 0 : i32
    return %arg0, %c0_i32, %c0_i32_0 : i32, i32, i32
  }
}

</mosaic_0001>

<bundles_post_ra>
// kernel: tpu_custom_call.1
= control target key start
LH: loop header
LB: loop body
LE: loop exit
PB: predicated region body
PF: predicated region fallthrough
CT: control target
= control target key end

     0   :  { %8 = vsyncpa [#allocation4], 0  ;;  %s986_s0 = inlined_call_operand.vmem [shape: f32[4,1], index: 0, kind: input, shape index: {}]   ;;  %s987_s1 = inlined_call_operand.hbm [shape: f32[2,4,256], index: 1, kind: input, shape index: {}]   ;;  %s988_s2 = inlined_call_operand.vmem [shape: s32[2,1,256], index: 2, kind: input, shape index: {}]   ;;  %s989_s3 = inlined_call_operand.hbm [shape: f32[2,8,128], index: 3, kind: output, shape index: {}]  }
   0x1   :  { %10 = vsyncpa [#allocation4 + $0x1], 0 }
   0x2   :  { %11 = vsyncpa [#allocation5], 0 }
   0x3   :  { %13 = vsyncpa [#allocation5 + $0x1], 0  ;;  %s816_s12 = smov 0   ;;  %s818_s13 = smov 0  }
   0x4   :  { %s820_s14 = smov 0   ;;  %s822_s15 = smov 0  }
   0x5   :  { %s824_s16 = smov 0   ;;  %s826_s17 = smov 0  }
   0x6 LB: > { %s581_s18 = sadd.s32 4294967295, %s792_s17   ;;  %s582_s19 = sadd.s32 4294967294, %s792_s17   ;;  %s792_s17 = sphi %s826_s17, %s19_s17   ;;  %s788_s16 = sphi %s824_s16, %s998_s16   ;;  %s784_s15 = sphi %s822_s15, %s997_s15   ;;  %s780_s14 = sphi %s820_s14, %s996_s14   ;;  %s776_s13 = sphi %s818_s13, %s995_s13   ;;  %s772_s12 = sphi %s816_s12, %s994_s12  }
   0x7   : > { %s31_s20 = sadd.s32 1, %s788_s16  ;;  %s61_s21 = sadd.s32 1, %s780_s14 }
   0x8   : > { %p33_p0 = scmp.ge.s32.totalorder %s31_s20, 2  ;;  %p68_p1 = scmp.ne.s32.totalorder %s780_s14, %s776_s13 }
   0x9   : > { %p69_p2 = scmp.eq.s32.totalorder %s792_s17, 0  ;;  %p74_p3 = scmp.ne.s32.totalorder %s776_s13, %s772_s12 }
   0xa   : > { %s1000_s20 = smov (%p33_p0, %s31_s20), 0  ;;  %p75_p5 = scmp.eq.s32.totalorder %s581_s18, 0 }
   0xb   : > { %p857_p4 = por %p69_p2, %p68_p1  ;;  %s56_s23 = ssub.s32 %s788_s16, %s1000_s20 }
   0xc   : > { %p126_p6 = scmp.eq.s32.totalorder %s581_s18, 1  ;;  %p59_p7 = scmp.eq.s32.totalorder %s56_s23, 0 }
   0xd   : > { %p863_p8 = por %p75_p5, %p74_p3  ;;  %p132_p10 = scmp.eq.s32.totalorder %s582_s19, 1 }
   0xe   : > { %p867_p9 = por %p126_p6, %p68_p1  ;;  %p584_p12 = scmp.ge.s32.totalorder %s792_s17, 2 }
   0xf   : > { %s872_s26 = scalar_select %p59_p7, %s780_s14, %s61_s21  }
  0x10   : > { %p874_p11 = por %p132_p10, %p74_p3  ;;  %p617_p13 = scmp.lt.s32.totalorder %s792_s17, 2 }
  0x11   : > { %s155_s28 = sand.u32 1, %s780_s14   ;;  %s598_s30 = sshll.u32 %s788_s16, 3 }
  0x12   : > { %s585_s29 = sshll.u32 %s155_s28, 3  ;;  %s166_s6 = scalar_lea.hbm %s987_s1, %s598_s30 }
  0x13   : > { %s159_s7 = scalar_lea.vmem [#allocation3], %s585_s29  ;;  %s168_s9 = sshll.u32 %s166_s6, 4  ;;  %s169_s9 = int_to_ptr.hbm [resolvable:$true] %s168_s9 }
  0x14   : > { %s170_s8 = sshll.u32 %s159_s7, 4  ;;  %p610_p0 = pnand %p617_p13, %p857_p4  ;;  %s171_s8 = int_to_ptr.vmem [resolvable:$true] %s170_s8 }
  0x15   : > { %p588_p1 = scmp.ge.s32.totalorder %s792_s17, 1  ;;  %p187_p2 = scmp.lt.s32.totalorder %s792_s17, 3 }
  0x16   : > { %s156_s10 = scalar_lea.sflag [#allocation4], %s155_s28 }
  0x17   : > { %612 = dma.hbm_to_vmem [thread:$0]  (!%p610_p0), %s169_s9, 128, %s171_s8, %s156_s10  }
  0x18   : > { %p188_p3 = pnand %p588_p1, %p187_p2 }
  0x19   : > { %s890_s11 = sand.u32 (!%p188_p3), 1, %s776_s13  }
  0x1a   : > { %191 = sbr.rel (%p188_p3) target bundleno = 447 (0x1bf), region = 32  ;;  %s589_s18 = sshll.u32 (!%p188_p3), %s890_s11, 3 }
  0x1b   : > { %s194_s19 = scalar_lea.sflag (!%p188_p3), [#allocation4], %s890_s11  ;;  %s197_s21 = scalar_lea.vmem (!%p188_p3), [#allocation3], %s589_s18 }
  0x1f   : > { %763 = dma.done.wait (%p863_p8), %s194_s19, 128  }
  0x20   : > { %765 = vsyncadd (%p863_p8), %s194_s19, 4294967168  ;;  %v239_v0 = vld [vmem:[%s197_s21] sm:$0xff]  ;;  %vm258_vm0 = vcmask 1043456   ;;  %p231_p4 = scmp.lt.s32.totalorder %s784_s15, 1  ;;  %v794_v27 = vmov 0   ;;  %v242_v31 = vlaneseq  ;;  %v795_v38 = vmov 0.0  }
  0x21   : > { %253 = vst [vmem:[#allocation1] ss:$2 sm:$0xff] %v239_v0  ;;  %v349_v21 = vmul.f32 0.5, %v239_v0  ;;  %669 = vset.pattern.permute.xlu0 %v794_v27  ;;  %v241_v52 = vld [vmem:[%s986_s0] sm:$0xf]  ;;  %vm448_vm7 = vcmask 3072  }
  0x22   : > { %s232_s22 = scalar_select %p231_p4, %s784_s15, 1  ;;  %v914_v33 = vshrl.u32 %v242_v31, 7  ;;  %vm380_vm8 = vcmask 1040384   ;;  %vm417_vm9 = vcmask 1041408  }
  0x23   : > { %s595_s5 = sshll.u32 %s784_s15, 3  ;;  %s228_s10 = scalar_lea.vmem [#allocation6], %s589_s18 }
  0x24   : > { %s591_s23 = sshll.u32 %s232_s22, 1  ;;  %s480_s8 = scalar_lea.hbm %s989_s3, %s595_s5  ;;  %vm461_vm10 = vcmp.eq.s32.totalorder %v914_v33, 2  ;;  %vm460_vm11 = vcmp.eq.s32.totalorder %v914_v33, 1  ;;  %vm459_vm12 = vcmp.eq.s32.totalorder %v914_v33, 0 }
  0x25   : > { %s237_s29 = scalar_lea.vmem %s988_s2, %s591_s23  ;;  %s482_s19 = sshll.u32 %s228_s10, 4  ;;  %s483_s19 = int_to_ptr.vmem [resolvable:$true] %s482_s19 }
  0x26   : > { %v240_v32 = vld [vmem:[%s237_s29] sm:$0x3]  ;;  %s484_s22 = sshll.u32 %s480_s8, 4  ;;  %s470_s15 = scalar_lea.sflag [#allocation5], %s890_s11  ;;  %s485_s22 = int_to_ptr.hbm [resolvable:$true] %s484_s22 }
  0x27   : > { %v244_v34 = vperm.slane %v240_v32, 0  ;;  %v245_v35 = vperm.slane %v240_v32, 1  ;;  %s724_s18 = sshra.s32 %s485_s22, 4  ;;  %s730_s30 = scalar_lea.hbm %s989_s3, 16  ;;  %s725_s18 = int_to_ptr.hbm [resolvable:$true] %s724_s18 }
  0x28   : > { %v254_v1 = vld.sshfl [vmem:[#allocation1] sm:$0xff pattern:$0x75316420]  ;;  %v255_v2 = vld.sshfl [vmem:[#allocation1 + $0x8] sm:$0xff pattern:$0x75316420]  ;;  %p731_p8 = scmp.lt.s32.totalorder %s725_s18, %s989_s3 }
  0x29   : > { %v259_v3 = vsel %vm258_vm0, %v254_v1, -inf  ;;  %v266_v4 = vsel %vm258_vm0, %v255_v2, -inf  ;;  %vm246_vm1 = vcmp.eq.s32.totalorder %v914_v33, %v244_v34  ;;  %vm247_vm2 = vcmp.eq.s32.totalorder %v914_v33, %v245_v35  ;;  %s726_s24 = scalar_lea.hbm %s725_s18, 8 }
  0x2a   : > { %v260_v5 = vrot.slane %v259_v3, 4  ;;  %v267_v6 = vrot.slane %v266_v4, 4  ;;  %v918_v39 = vsel %vm246_vm1, 1.0, %v795_v38  ;;  %v920_v40 = vsel %vm247_vm2, 1.0, %v795_v38  ;;  %p727_p5 = scmp.ne.s32.totalorder %s725_s18, %s726_s24  ;;  %p732_p10 = scmp.lt.s32.totalorder %s730_s30, %s726_s24 }
  0x2c   : > { %v261_v7 = vmax.f32 %v259_v3, %v260_v5  ;;  %v268_v8 = vmax.f32 %v266_v4, %v267_v6  ;;  %p728_p6 = pnand %p727_p5, %p867_p9  ;;  %p733_p13 = por %p732_p10, %p731_p8 }
  0x2e   : > { %v262_v9 = vrot.slane %v261_v7, 2  ;;  %v269_v10 = vrot.slane %v268_v8, 2  ;;  %p729_p7 = pneg %p728_p6 }
  0x30   : > { %v263_v11 = vmax.f32 %v261_v7, %v262_v9  ;;  %v270_v12 = vmax.f32 %v268_v8, %v269_v10  ;;  %p734_p0 = pnand %p733_p13, %p729_p7 }
  0x32   : > { %v264_v13 = vrot.slane %v263_v11, 1  ;;  %v271_v14 = vrot.slane %v270_v12, 1 }
  0x34   : > { %v902_v15 = vmax.f32 %v263_v11, %v264_v13  ;;  %v904_v16 = vmax.f32 %v270_v12, %v271_v14 }
  0x36   : > { %v275_v17 = vrot.slane %v904_v16, 4 }
  0x38   : > { %v276_v18 = vsel %vm258_vm0, %v902_v15, %v275_v17 }
  0x39   : > { %v278_v19 = vsub.f32 %v239_v0, %v276_v18 }
  0x3b   : > { %v279_v20 = vmul.f32 1.442695, %v278_v19 }
  0x3d   : > { %670 = vpow2.f32 %v279_v20 }
  0x3e   : > { %672 = vtanh.f32 %v349_v21 }
  0x43   : > { %v671_v22 = vpop.eup %670 }
  0x44   : > { %282 = vst [vmem:[#allocation1] ss:$2 sm:$0xff] %v671_v22  ;;  %v673_v23 = vpop.eup %672 }
  0x45   : > { %v351_v26 = vmul.f32 0.5, %v673_v23 }
  0x47   : > { %v352_v28 = vadd.f32 0.5, %v351_v26 }
  0x4b   : > { %v283_v24 = vld.sshfl [vmem:[#allocation1] sm:$0xff pattern:$0x75316420]  ;;  %v284_v25 = vld.sshfl [vmem:[#allocation1 + $0x8] sm:$0xff pattern:$0x75316420] }
  0x4c   : > { %307 = vst [vmem:[#allocation1] ss:$2 sm:$0xff] %v239_v0  ;;  %v294_v53 = vsel %vm258_vm0, %v284_v25, 0.0  ;;  %v287_v54 = vsel %vm258_vm0, %v283_v24, 0.0 }
  0x4d   : > { %v295_v55 = vrot.slane %v294_v53, 4  ;;  %v288_v56 = vrot.slane %v287_v54, 4 }
  0x4f   : > { %v296_v57 = vadd.f32 %v295_v55, %v294_v53  ;;  %v289_v58 = vadd.f32 %v288_v56, %v287_v54 }
  0x51   : > { %v297_v59 = vrot.slane %v296_v57, 2  ;;  %v290_v61 = vrot.slane %v289_v58, 2 }
  0x53   : > { %v308_v29 = vld.sshfl [vmem:[#allocation1] sm:$0xff pattern:$0x75316420]  ;;  %v309_v30 = vld.sshfl [vmem:[#allocation1 + $0x8] sm:$0xff pattern:$0x75316420]  ;;  %v298_v63 = vadd.f32 %v297_v59, %v296_v57  ;;  %v291_v3 = vadd.f32 %v290_v61, %v289_v58 }
  0x54   : > { %354 = vst [vmem:[#allocation1] ss:$2 sm:$0xff] %v352_v28  ;;  %v313_v60 = vmul.f32 %v920_v40, %v309_v30  ;;  %v312_v0 = vmul.f32 %v918_v39, %v308_v29 }
  0x55   : > { %v299_v5 = vrot.slane %v298_v63, 1  ;;  %v292_v8 = vrot.slane %v291_v3, 1 }
  0x56   : > { %v321_v2 = vsel %vm258_vm0, %v313_v60, 0.0  ;;  %v314_v6 = vsel %vm258_vm0, %v312_v0, 0.0 }
  0x57   : > { %v322_v7 = vrot.slane %v321_v2, 4  ;;  %v315_v9 = vrot.slane %v314_v6, 4  ;;  %v300_v10 = vadd.f32 %v299_v5, %v298_v63  ;;  %v293_v12 = vadd.f32 %v292_v8, %v291_v3 }
  0x59   : > { %v323_v11 = vadd.f32 %v322_v7, %v321_v2  ;;  %v316_v14 = vadd.f32 %v315_v9, %v314_v6 }
  0x5b   : > { %v355_v36 = vld.sshfl [vmem:[#allocation1] sm:$0xff pattern:$0x75316420]  ;;  %v356_v37 = vld.sshfl [vmem:[#allocation1 + $0x8] sm:$0xff pattern:$0x75316420] }
  0x5c   : > { %361 = vst [vmem:[#allocation1] ss:$2 sm:$0xff] %v352_v28  ;;  %v359_v43 = vmul.f32 %v918_v39, %v355_v36  ;;  %v360_v44 = vmul.f32 %v920_v40, %v356_v37  ;;  %v324_v18 = vrot.slane %v323_v11, 2  ;;  %v317_v21 = vrot.slane %v316_v14, 2 }
  0x5e   : > { %v325_v25 = vadd.f32 %v324_v18, %v323_v11  ;;  %v318_v30 = vadd.f32 %v317_v21, %v316_v14 }
  0x60   : > { %v326_v38 = vrot.slane %v325_v25, 1 }
  0x63   : > { %v362_v41 = vld.sshfl [vmem:[#allocation1] sm:$0xff pattern:$0x75316420]  ;;  %v363_v42 = vld.sshfl [vmem:[#allocation1 + $0x8] sm:$0xff pattern:$0x75316420] }
  0x64   : > { %v366_v45 = vadd.f32 %v918_v39, %v362_v41  ;;  %v367_v46 = vadd.f32 %v920_v40, %v363_v42 }
  0x66   : > { %v374_v47 = vrot.slane %v366_v45, 4  ;;  %v375_v48 = vrot.slane %v367_v46, 4  ;;  %v319_v46 = vrot.slane %v318_v30, 1 }
  0x68   : > { %v378_v49 = vsel %vm258_vm0, %v359_v43, %v374_v47  ;;  %v379_v50 = vsel %vm258_vm0, %v360_v44, %v375_v48  ;;  %v320_v54 = vadd.f32 %v319_v46, %v318_v30 }
  0x69   : > { %v414_v51 = vadd.f32 %v379_v50, %v378_v49 }
  0x6b   : > { %415 = vadd.xlane.f32.xlu0 %v414_v51  ;;  %v327_v51 = vadd.f32 %v326_v38, %v325_v25 }
  0x7f   : > { %330 = vperm.xlu0 %669, %v241_v52  }
  0xde   : > { %v416_v62 = vpop.xlane.xlu0 %415 }
  0xdf   : > { %v428_v1 = vadd.f32 1e-05, %v416_v62  ;;  %v426_v20 = vmul.f32 2.0, %v416_v62 }
  0xe1   : > { %v430_v4 = vrot.slane %v428_v1, 4  ;;  %v427_v28 = vadd.f32 1e-05, %v426_v20 }
  0xe3   : > { %674 = vrcp.f32 %v430_v4  ;;  %v443_v22 = vand.u32 2147483648, %v430_v4  ;;  %v441_v24 = vand.u32 2147483647, %v430_v4  ;;  %vm437_vm4 = vweird.f32 %v430_v4 }
  0xe4   : > { %676 = vlog2.f32 %v300_v10 }
  0xe5   : > { %678 = vlog2.f32 %v293_v12  ;;  %v444_v31 = vor.u32 1.1754944e-38, %v443_v22  ;;  %vm442_vm6 = vcmp.eq.f32.partialorder %v441_v24, 8.507059e+37 }
  0xe9   : > { %v675_v13 = vpop.eup %674 }
  0xea   : > { %v433_v17 = vmul.f32 %v675_v13, %v430_v4  ;;  %vm438_vm3 = vweird.f32 %v675_v13  ;;  %v677_v26 = vpop.eup %676 }
  0xeb   : > { %vm439_vm5 = vmor %vm437_vm4, %vm438_vm3  ;;  %v679_v32 = vpop.eup %678  ;;  %v304_v37 = vmul.f32 0.6931472, %v677_v26 }
  0xec   : > { %v434_v19 = vsub.f32 1.0, %v433_v17  ;;  %v302_v45 = vmul.f32 0.6931472, %v679_v32 }
  0xee   : > { %v435_v23 = vmul.f32 %v675_v13, %v434_v19  ;;  %v305_v53 = vadd.f32 %v302_v45, %v902_v15 }
  0xf0   : > { %v436_v27 = vadd.f32 %v675_v13, %v435_v23  ;;  %v368_v62 = vsub.f32 %v305_v53, %v320_v54 }
  0xf1   : > { %v331_v29 = vpop.permute.xlu0 %330 }
  0xf2   : > { %v333_v34 = vmul.f32 %v918_v39, %v331_v29  ;;  %v334_v35 = vmul.f32 %v920_v40, %v331_v29  ;;  %v440_v36 = vsel %vm439_vm5, %v675_v13, %v436_v27  ;;  %v306_v40 = vadd.f32 %v304_v37, %v904_v16 }
  0xf3   : > { %v445_v41 = vsel %vm442_vm6, %v444_v31, %v440_v36 }
  0xf4   : > { %v335_v42 = vsel %vm258_vm0, %v333_v34, 0.0  ;;  %v342_v43 = vsel %vm258_vm0, %v334_v35, 0.0  ;;  %v446_v44 = vmul.f32 %v445_v41, %v427_v28  ;;  %v369_v59 = vsub.f32 %v306_v40, %v327_v51 }
  0xf5   : > { %v336_v47 = vrot.slane %v335_v42, 4  ;;  %v343_v48 = vrot.slane %v342_v43, 4 }
  0xf6   : > { %v447_v49 = vsub.f32 1.0, %v446_v44 }
  0xf7   : > { %v337_v50 = vadd.f32 %v336_v47, %v335_v42  ;;  %v344_v39 = vadd.f32 %v343_v48, %v342_v43 }
  0xf8   : > { %v449_v52 = vsel %vm448_vm7, %v447_v49, 0.0 }
  0xf9   : > { %v338_v55 = vrot.slane %v337_v50, 2  ;;  %v345_v56 = vrot.slane %v344_v39, 2  ;;  %450 = vadd.xlane.f32.xlu1 %v449_v52 }
  0xfb   : > { %v339_v57 = vadd.f32 %v338_v55, %v337_v50  ;;  %v346_v58 = vadd.f32 %v345_v56, %v344_v39 }
  0xfd   : > { %v340_v60 = vrot.slane %v339_v57, 1  ;;  %v347_v61 = vrot.slane %v346_v58, 1 }
  0xff   : > { %v341_v63 = vadd.f32 %v340_v60, %v339_v57  ;;  %v348_v0 = vadd.f32 %v347_v61, %v346_v58 }
 0x101   : > { %v370_v1 = vmul.f32 %v368_v62, %v341_v63  ;;  %v371_v2 = vmul.f32 %v369_v59, %v348_v0 }
 0x103   : > { %v381_v16 = vsel %vm380_vm8, %v370_v1, %v341_v63  ;;  %v382_v3 = vsel %vm380_vm8, %v371_v2, %v348_v0 }
 0x104   : > { %389 = vst [vmem:[#allocation2 + $0x18] sm:$0x3] %v381_v16 }
 0x105   : > { %390 = vst [vmem:[#allocation2 + $0x8] sm:$0x3] %v382_v3 }
 0x10b   : > { %v412_v15 = vld [vmem:[#allocation2 + $0x18] sm:$0x3] }
 0x10c   : > { %v413_v4 = vld [vmem:[#allocation2 + $0x8] sm:$0x3]  ;;  %v418_v5 = vsel %vm417_vm9, %v412_v15, 0.0 }
 0x10d   : > { %v419_v6 = vsel %vm417_vm9, %v413_v4, 0.0 }
 0x10e   : > { %v420_v7 = vadd.f32 %v419_v6, %v418_v5 }
 0x110   : > { %421 = vadd.xlane.f32.xlu1 %v420_v7 }
 0x16c   : > { %v451_v8 = vpop.xlane.xlu1 %450 }
 0x16d   : > { %v452_v9 = vrot.slane %v451_v8, 4 }
 0x16f   : > { %v453_v10 = vadd.f32 %v452_v9, %v451_v8 }
 0x171   : > { %v454_v11 = vrot.slane %v453_v10, 2 }
 0x173   : > { %v455_v12 = vadd.f32 %v454_v11, %v453_v10 }
 0x175   : > { %v456_v13 = vrot.slane %v455_v12, 1 }
 0x177   : > { %v457_v18 = vadd.f32 %v456_v13, %v455_v12 }
 0x183   : > { %v422_v14 = vpop.xlane.xlu1 %421 }
 0x184   : > { %v424_v17 = vrot.slane %v422_v14, 1  ;;  %599 = vpush %v422_v14 }
 0x186   : > { %601 = vpush %v424_v17 }
 0x187   : > { %603 = vpush %v457_v18 }
 0x1b5   : > { %s600_s9 = spop %599 }
 0x1b6   : > { %v464_v20 = vstv %s600_s9 }
 0x1b7   : > { %s602_s21 = spop %601 }
 0x1b8   : > { %v462_v19 = vstv %s602_s21  ;;  %s604_s23 = spop %603 }
 0x1b9   : > { %v463_v21 = vsel %vm461_vm10, %v462_v19, 0.0  ;;  %v466_v23 = vstv %s604_s23 }
 0x1ba   : > { %v465_v22 = vsel %vm460_vm11, %v464_v20, %v463_v21 }
 0x1bb   : > { %v467_v24 = vsel %vm459_vm12, %v466_v23, %v465_v22 }
 0x1bc   : > { %468 = vst [vmem:[%s228_s10] sm:$0xff] %v467_v24 }
 0x1bd   : > { %737 = shalt.err (!%p734_p0)
}
 0x1be   : > { %607 = dma.vmem_to_hbm [thread:$0]  (%p867_p9), %s483_s19, 128, %s485_s22, %s470_s15  }
 0x1bf PF: > { %s496_s11 = sand.u32 1, %s772_s12   ;;  %p614_p1 = pnand %p584_p12, %p874_p11 }
 0x1c0   : > { %s497_s6 = scalar_lea.sflag [#allocation5], %s496_s11 }
 0x1c1   : > { %p615_p2 = pneg %p614_p1 }
 0x1c3   : > { %767 = dma.done.wait (%p615_p2), %s497_s6, 128  }
 0x1c4   : > { %769 = vsyncadd (%p615_p2), %s497_s6, 4294967168  ;;  %s19_s17 = sadd.s32 1, %s792_s17   ;;  %s994_s12 = smov %s776_s13 }
 0x1c5   : > { %p16_p3 = scmp.ge.s32.totalorder %s19_s17, 4   ;;  %s995_s13 = smov %s780_s14 }
 0x1c6   : > { %s996_s14 = smov %s872_s26  ;;  %s997_s15 = smov %s788_s16 }
 0x1c7   : > { %s998_s16 = smov %s1000_s20  ;;  %18 = sbr.rel (!%p16_p3) target bundleno = 6 (0x6), region = 92 }
 0x1cc   :  { %503 = vsyncpa [#allocation4], 1 }
 0x1cd   :  { %505 = vsyncpa [#allocation4 + $0x1], 1 }
 0x1ce   :  { %506 = vsyncpa [#allocation5], 1 }
 0x1cf   :  { %508 = vsyncpa [#allocation5 + $0x1], 1 }

</bundles_post_ra>
